<compile_context>
chip_gen: v5e
topology: v5e:2x2
jax: 0.10.0
libtpu: 0.0.40
codegen_flags: <defaults>
</compile_context>

<pallas_src>
import functools

import jax
import jax.numpy as jnp
from jax.experimental import pallas as pl
from jax.experimental.pallas import tpu as pltpu

EPS = 1e-5


# ----------------------------------------------------------------------------
# small helpers
# ----------------------------------------------------------------------------
def _round_up(x, m):
    return ((x + m - 1) // m) * m


def _vmem_limit_bytes():
    # Generation-aware budget: 64 MiB physical on v7x, 128 MiB on v5e/v6e.
    try:
        cap = int(pltpu.get_tpu_info().vmem_capacity_bytes)
    except Exception:
        cap = 64 * 1024 * 1024
    return int(cap * 3 // 4)


def _k_tiling(k):
    # Pad K to a multiple of 128 (A's lane dim) for clean MXU feeds.
    if k <= 1024:
        k_pad = _round_up(k, 128)
        return k_pad, k_pad
    k_pad = _round_up(k, 512)
    return k_pad, 512


def _choose_tm(m, tk, n_pad, budget):
    """Largest M tile whose (full-N, double-buffered) working set fits the
    VMEM budget; then capped so the grid keeps >= 2 M tiles (v7x dual-TC)."""
    m_cap = _round_up(max(m, 8), 8)
    tm = 8
    for cand in (2048, 1024, 512, 256, 128, 64, 32, 16, 8):
        if cand > m_cap:
            continue
        per_step = (2 * cand * tk * 2          # A, bf16, double-buffered
                    + 2 * tk * n_pad * 2       # B (full-N), bf16, double-buffered
                    + 2 * cand * n_pad * 2     # out, bf16, double-buffered
                    + cand * n_pad * 4         # f32 accumulator scratch
                    + 4 * 8 * n_pad * 4)       # bias + stats (small)
        if per_step <= budget:
            tm = cand
            break
    if m >= 32:
        half = _round_up(-(-m // 2), 8)        # ceil(m/2) rounded to sublane
        tm = min(tm, half)
    return max(tm, 8)


# ----------------------------------------------------------------------------
# Pallas kernels
# ----------------------------------------------------------------------------
def _conv_mm_kernel(a_ref, b_ref, bias_ref, o_ref, stats_ref, acc_ref):
    """(tm,tk)@(tk,n_pad) K-accumulated matmul (bf16 operands, f32 acc) with a
    fused epilogue: add conv bias, store bf16, and emit per-M-tile pre-bias
    channel sum / sum-of-squares for training-mode BatchNorm statistics."""
    kk = pl.program_id(1)

    @pl.when(kk == 0)
    def _init():
        acc_ref[...] = jnp.zeros_like(acc_ref)

    acc_ref[...] += jnp.dot(a_ref[...], b_ref[...],
                            preferred_element_type=jnp.float32)

    @pl.when(kk == pl.num_programs(1) - 1)
    def _finalize():
        acc = acc_ref[...]
        o_ref[...] = (acc + bias_ref[...]).astype(o_ref.dtype)
        n = acc.shape[1]
        s = jnp.sum(acc, axis=0, keepdims=True)          # (1, n) pre-bias sum
        q = jnp.sum(acc * acc, axis=0, keepdims=True)    # (1, n) pre-bias sumsq
        row = jax.lax.broadcasted_iota(jnp.int32, (8, n), 0)
        stats = jnp.where(row < 4,
                          jnp.broadcast_to(s, (8, n)),
                          jnp.broadcast_to(q, (8, n)))
        stats_ref[...] = stats.reshape(1, 8, n)


def _bn_act_kernel(y_ref, scale_ref, bias_ref, o_ref, *, relu):
    out = y_ref[...].astype(jnp.float32) * scale_ref[...] + bias_ref[...]
    if relu:
        out = jnp.maximum(out, 0.0)
    o_ref[...] = out.astype(o_ref.dtype)


def _bn_res_relu_kernel(y_ref, s_ref, b_ref, r_ref, sr_ref, br_ref, o_ref):
    # relu( bn2(y2) + bn_s(res) ) — shortcut BN fused, never materialized.
    out = (y_ref[...].astype(jnp.float32) * s_ref[...] + b_ref[...]
           + r_ref[...].astype(jnp.float32) * sr_ref[...] + br_ref[...])
    o_ref[...] = jnp.maximum(out, 0.0).astype(o_ref.dtype)


# ----------------------------------------------------------------------------
# Pallas wrappers
# ----------------------------------------------------------------------------
def conv_matmul(a, b, bias_p, tm, tk, vmem_limit):
    """a:(m_pad,k_pad) bf16, b:(k_pad,n_pad) bf16, bias_p:(n_pad,) f32.
    B is full-N resident so A is streamed from HBM exactly once."""
    m_pad, k_pad = a.shape
    n_pad = b.shape[1]
    gm, gk = m_pad // tm, k_pad // tk

    y, stats = pl.pallas_call(
        _conv_mm_kernel,
        out_shape=(
            jax.ShapeDtypeStruct((m_pad, n_pad), jnp.bfloat16),
            jax.ShapeDtypeStruct((gm, 8, n_pad), jnp.float32),
        ),
        grid=(gm, gk),
        in_specs=(
            pl.BlockSpec((tm, tk), lambda i, kk: (i, kk)),
            pl.BlockSpec((tk, n_pad), lambda i, kk: (kk, 0)),
            pl.BlockSpec((1, n_pad), lambda i, kk: (0, 0)),
        ),
        out_specs=(
            pl.BlockSpec((tm, n_pad), lambda i, kk: (i, 0)),
            pl.BlockSpec((1, 8, n_pad), lambda i, kk: (i, 0, 0)),
        ),
        scratch_shapes=[pltpu.VMEM((tm, n_pad), jnp.float32)],
        compiler_params=pltpu.CompilerParams(
            dimension_semantics=("parallel", "arbitrary"),
            vmem_limit_bytes=vmem_limit),
    )(a, b, bias_p.reshape(1, -1))
    return y, stats


def bn_act(y, scale, bias, relu, tm, vmem_limit, out_dtype=jnp.bfloat16):
    m_pad, n_pad = y.shape
    return pl.pallas_call(
        functools.partial(_bn_act_kernel, relu=relu),
        out_shape=jax.ShapeDtypeStruct((m_pad, n_pad), out_dtype),
        grid=(m_pad // tm,),
        in_specs=(
            pl.BlockSpec((tm, n_pad), lambda i: (i, 0)),
            pl.BlockSpec((1, n_pad), lambda i: (0, 0)),
            pl.BlockSpec((1, n_pad), lambda i: (0, 0)),
        ),
        out_specs=pl.BlockSpec((tm, n_pad), lambda i: (i, 0)),
        compiler_params=pltpu.CompilerParams(
            dimension_semantics=("parallel",),
            vmem_limit_bytes=vmem_limit),
    )(y, scale, bias)


def bn_res_relu(y, scale, bias, res, res_scale, res_bias, tm, vmem_limit):
    m_pad, n_pad = y.shape
    tile = lambda i: (i, 0)
    vec = lambda i: (0, 0)
    return pl.pallas_call(
        _bn_res_relu_kernel,
        out_shape=jax.ShapeDtypeStruct((m_pad, n_pad), jnp.float32),
        grid=(m_pad // tm,),
        in_specs=(
            pl.BlockSpec((tm, n_pad), tile),
            pl.BlockSpec((1, n_pad), vec),
            pl.BlockSpec((1, n_pad), vec),
            pl.BlockSpec((tm, n_pad), tile),
            pl.BlockSpec((1, n_pad), vec),
            pl.BlockSpec((1, n_pad), vec),
        ),
        out_specs=pl.BlockSpec((tm, n_pad), tile),
        compiler_params=pltpu.CompilerParams(
            dimension_semantics=("parallel",),
            vmem_limit_bytes=vmem_limit),
    )(y, scale, bias, res, res_scale, res_bias)


# ----------------------------------------------------------------------------
# Glue: bf16 im2col, weight packing, BN statistics from fused partial sums
# ----------------------------------------------------------------------------
def im2col_bf16(x_nhwc, ksize, stride, padding, m_pad, k_pad):
    """Patch matrix built directly in bf16 with M/K padding folded in."""
    n, h, w, c = x_nhwc.shape
    hp, wp = h + 2 * padding, w + 2 * padding
    ho = (hp - ksize) // stride + 1
    wo = (wp - ksize) // stride + 1
    xp = jnp.pad(x_nhwc.astype(jnp.bfloat16),
                 ((0, 0), (padding, padding), (padding, padding), (0, 0)))
    taps = []
    for dy in range(ksize):
        for dx in range(ksize):
            taps.append(xp[:, dy: dy + (ho - 1) * stride + 1: stride,
                              dx: dx + (wo - 1) * stride + 1: stride, :])
    pat = jnp.concatenate(taps, axis=-1).reshape(n * ho * wo, ksize * ksize * c)
    m, k = pat.shape
    pat = jnp.pad(pat, ((0, m_pad - m), (0, k_pad - k)))
    return pat, ho, wo


def pack_weight(w_oihw):
    # (Cout, Cin, kh, kw) -> (kh*kw*Cin, Cout), matching im2col's (dy,dx,cin) order
    cout, cin, kh, kw = w_oihw.shape
    return jnp.transpose(w_oihw, (2, 3, 1, 0)).reshape(kh * kw * cin, cout)


def conv2d_mat(x_nhwc, w_oihw, b, stride, padding, tm, m_pad, vmem_limit):
    cout, cin, kh, _ = w_oihw.shape
    k = kh * kh * cin
    k_pad, tk = _k_tiling(k)
    n_pad = _round_up(cout, 128)
    patches, ho, wo = im2col_bf16(x_nhwc, kh, stride, padding, m_pad, k_pad)
    wmat = jnp.pad(pack_weight(w_oihw),
                   ((0, k_pad - k), (0, n_pad - cout))).astype(jnp.bfloat16)
    bias_p = jnp.pad(b, (0, n_pad - cout)).astype(jnp.float32)
    y, stats = conv_matmul(patches, wmat, bias_p, tm, tk, vmem_limit)
    return y, stats, bias_p, n_pad, ho, wo


def bn_scale_bias_from_stats(stats, bias_conv_p, gamma_p, beta_p, m):
    """Training-mode BN (biased variance) from the matmul's per-M-tile partial
    sums.  Stats are computed on the PRE-BIAS f32 accumulator, so padded rows
    contribute exactly zero (no fixup) and the conv bias is added to the mean
    analytically, keeping the E[x^2]-E[x]^2 term un-shifted."""
    ch_sum = jnp.sum(stats[:, 0, :], axis=0)        # sublanes 0-3: sum(acc)
    ch_sq = jnp.sum(stats[:, 4, :], axis=0)         # sublanes 4-7: sum(acc^2)
    mean_acc = ch_sum / m
    var = jnp.maximum(ch_sq / m - mean_acc * mean_acc, 0.0)
    mean = mean_acc + bias_conv_p
    scale = gamma_p / jnp.sqrt(var + EPS)
    bias = beta_p - mean * scale
    return scale.reshape(1, -1), bias.reshape(1, -1)


# ----------------------------------------------------------------------------
# BasicBlock forward
# ----------------------------------------------------------------------------
def init_basic_block_params(key, blk_in, blk_mid, stride=1):
    expansion = 1
    ks = jax.random.split(key, 6)
    params = {
        "w1": 0.1 * jax.random.normal(ks[0], (blk_mid, blk_in, 3, 3), jnp.float32),
        "b1": 0.1 * jax.random.normal(ks[1], (blk_mid,), jnp.float32),
        "gamma1": jnp.ones((blk_mid,), jnp.float32),
        "beta1": jnp.zeros((blk_mid,), jnp.float32),
        "w2": 0.1 * jax.random.normal(ks[2], (blk_mid * expansion, blk_mid, 3, 3), jnp.float32),
        "b2": 0.1 * jax.random.normal(ks[3], (blk_mid * expansion,), jnp.float32),
        "gamma2": jnp.ones((blk_mid * expansion,), jnp.float32),
        "beta2": jnp.zeros((blk_mid * expansion,), jnp.float32),
    }
    needs_proj = stride != 1 or blk_in != expansion * blk_mid
    if needs_proj:
        params.update({
            "ws": 0.1 * jax.random.normal(ks[4], (blk_mid * expansion, blk_in, 1, 1), jnp.float32),
            "bs": 0.1 * jax.random.normal(ks[5], (blk_mid * expansion,), jnp.float32),
            "gammas": jnp.ones((blk_mid * expansion,), jnp.float32),
            "betas": jnp.zeros((blk_mid * expansion,), jnp.float32),
        })
    return params, needs_proj


def basic_block_forward(x_nchw, params, stride, needs_proj):
    n, cin, h, w = x_nchw.shape
    x = jnp.transpose(x_nchw, (0, 2, 3, 1)).astype(jnp.float32)   # NHWC
    mid = params["w1"].shape[0]
    cout = params["w2"].shape[0]

    ho = (h + 2 - 3) // stride + 1
    wo = (w + 2 - 3) // stride + 1
    m = n * ho * wo

    vmem_limit = _vmem_limit_bytes()
    _, tk_ref = _k_tiling(9 * max(cin, mid))
    n_pad_ref = _round_up(max(mid, cout), 128)
    tm = _choose_tm(m, tk_ref, n_pad_ref, int(vmem_limit * 0.9))
    m_pad = _round_up(m, tm)

    # conv1 (+fused BN stats) -> bn1 + relu (stored bf16 for conv2's MXU)
    y1, st1, bias1p, np1, ho1, wo1 = conv2d_mat(
        x, params["w1"], params["b1"], stride, 1, tm, m_pad, vmem_limit)
    g1 = jnp.pad(params["gamma1"], (0, np1 - mid))
    be1 = jnp.pad(params["beta1"], (0, np1 - mid))
    sc1, bb1 = bn_scale_bias_from_stats(st1, bias1p, g1, be1, m)
    h1 = bn_act(y1, sc1, bb1, True, tm, vmem_limit)
    h1_nhwc = h1[:m, :mid].reshape(n, ho1, wo1, mid)

    # conv2 (+fused BN stats)
    y2, st2, bias2p, np2, _, _ = conv2d_mat(
        h1_nhwc, params["w2"], params["b2"], 1, 1, tm, m_pad, vmem_limit)
    g2 = jnp.pad(params["gamma2"], (0, np2 - cout))
    be2 = jnp.pad(params["beta2"], (0, np2 - cout))
    sc2, bb2 = bn_scale_bias_from_stats(st2, bias2p, g2, be2, m)

    # shortcut
    if needs_proj:
        ys, sts, biassp, nps, _, _ = conv2d_mat(
            x, params["ws"], params["bs"], stride, 0, tm, m_pad, vmem_limit)
        gs = jnp.pad(params["gammas"], (0, nps - cout))
        bes = jnp.pad(params["betas"], (0, nps - cout))
        res_scale, res_bias = bn_scale_bias_from_stats(sts, biassp, gs, bes, m)
        res = ys
    else:
        # identity: stride == 1 and cin == cout
        res = jnp.pad(x.reshape(m, cin).astype(jnp.bfloat16),
                      ((0, m_pad - m), (0, np2 - cin)))
        res_scale = jnp.ones((1, np2), jnp.float32)
        res_bias = jnp.zeros((1, np2), jnp.float32)

    # bn2 + shortcut-bn + residual add + relu, all fused (f32 module output)
    out = bn_res_relu(y2, sc2, bb2, res, res_scale, res_bias, tm, vmem_limit)
    out = out[:m, :cout].reshape(n, ho, wo, cout)
    return jnp.transpose(out, (0, 3, 1, 2))                       # back to NCHW


# ----------------------------------------------------------------------------
# Pure-JAX reference (mirrors the PyTorch forward in training mode, f32)
# ----------------------------------------------------------------------------
def _ref_conv(x, w, b, stride, padding):
    out = jax.lax.conv_general_dilated(
        x, w, window_strides=(stride, stride),
        padding=[(padding, padding), (padding, padding)],
        dimension_numbers=("NCHW", "OIHW", "NCHW"))
    return out + b.reshape(1, -1, 1, 1)


def _ref_bn(x, gamma, beta):
    mean = x.mean(axis=(0, 2, 3), keepdims=True)
    var = ((x - mean) ** 2).mean(axis=(0, 2, 3), keepdims=True)
    return (x - mean) / jnp.sqrt(var + EPS) * gamma.reshape(1, -1, 1, 1) + beta.reshape(1, -1, 1, 1)


def ref_basic_block(x, p, stride, needs_proj):
    out = jax.nn.relu(_ref_bn(_ref_conv(x, p["w1"], p["b1"], stride, 1), p["gamma1"], p["beta1"]))
    out = _ref_bn(_ref_conv(out, p["w2"], p["b2"], 1, 1), p["gamma2"], p["beta2"])
    if needs_proj:
        sc = _ref_bn(_ref_conv(x, p["ws"], p["bs"], stride, 0), p["gammas"], p["betas"])
    else:
        sc = x
    return jax.nn.relu(out + sc)


# ----------------------------------------------------------------------------
if __name__ == "__main__":
    key = jax.random.PRNGKey(0)
    fwd = jax.jit(basic_block_forward, static_argnums=(2, 3))

    N, H, W = 2, 16, 16
    configs = [
        (4, 8, 2),   # cin != mid, stride 2 -> projection shortcut path
        (8, 8, 1),   # cin == mid, stride 1 -> identity shortcut path
    ]
    for cin, mid, stride in configs:
        kx, kp, key = jax.random.split(key, 3)
        x = jax.random.normal(kx, (N, cin, H, W), jnp.float32)
        params, needs_proj = init_basic_block_params(kp, cin, mid, stride)

        out = jax.block_until_ready(fwd(x, params, stride, needs_proj))
        ref = jax.block_until_ready(ref_basic_block(x, params, stride, needs_proj))
        assert out.shape == ref.shape, (out.shape, ref.shape)
        # bf16 MXU operands + bf16 intermediate storage (f32 accumulation and
        # f32 BN statistics) -> relaxed tolerance vs the f32 reference.
        max_err = float(jnp.max(jnp.abs(out - ref)))
        assert jnp.allclose(out, ref, rtol=6e-2, atol=6e-2), (cin, mid, stride, max_err)

    print("KERNEL_OK")
</pallas_src>

<mosaic_0001>
module attributes {stable_mosaic.version = 11 : i64} {
  func.func @_conv_mm_kernel(%arg0: i32, %arg1: i32, %arg2: memref<64x128xbf16, #tpu.memory_space<vmem>>, %arg3: memref<128x128xbf16, #tpu.memory_space<vmem>>, %arg4: memref<1x128xf32, #tpu.memory_space<vmem>>, %arg5: memref<64x128xbf16, #tpu.memory_space<vmem>>, %arg6: memref<1x8x128xf32, #tpu.memory_space<vmem>>, %arg7: memref<64x128xf32, #tpu.memory_space<vmem>>) attributes {dimension_semantics = [#tpu.dimension_semantics<parallel>, #tpu.dimension_semantics<arbitrary>], iteration_bounds = array<i64: 2, 1>, scalar_prefetch = 0 : i64, scratch_operands = 1 : i64, tpu.core_type = #tpu.core_type<tc>, window_params = [{transform_indices = @transform_0, window_bounds = array<i64: 64, 128>}, {transform_indices = @transform_1, window_bounds = array<i64: 128, 128>}, {pipeline_mode = #tpu.pipeline_mode<synchronous>, transform_indices = @transform_2, window_bounds = array<i64: 1, 128>}, {transform_indices = @transform_3, window_bounds = array<i64: 64, 128>}, {transform_indices = @transform_4, window_bounds = array<i64: 1, 8, 128>}]} {
    %c0_i32 = arith.constant 0 : i32
    %0 = arith.cmpi eq, %arg1, %c0_i32 : i32
    %1 = arith.extui %0 : i1 to i32
    %c0_i32_0 = arith.constant 0 : i32
    %2 = arith.cmpi ne, %1, %c0_i32_0 : i32
    scf.if %2 {
      %cst_10 = arith.constant 0.000000e+00 : f32
      %12 = vector.broadcast %cst_10 : f32 to vector<64x128xf32>
      %c0_11 = arith.constant 0 : index
      %c0_12 = arith.constant 0 : index
      %13 = vector.load %arg7[%c0_11, %c0_12] : memref<64x128xf32, #tpu.memory_space<vmem>>, vector<64x128xf32>
      tpu.vector_store %arg7[%c0_11, %c0_12], %12 {strides = array<i32>} : memref<64x128xf32, #tpu.memory_space<vmem>>, vector<64x128xf32>,
    } else {
    }
    %c0 = arith.constant 0 : index
    %c0_1 = arith.constant 0 : index
    %3 = vector.load %arg7[%c0, %c0_1] : memref<64x128xf32, #tpu.memory_space<vmem>>, vector<64x128xf32>
    %c0_2 = arith.constant 0 : index
    %c0_3 = arith.constant 0 : index
    %4 = vector.load %arg2[%c0_2, %c0_3] : memref<64x128xbf16, #tpu.memory_space<vmem>>, vector<64x128xbf16>
    %c0_4 = arith.constant 0 : index
    %c0_5 = arith.constant 0 : index
    %5 = vector.load %arg3[%c0_4, %c0_5] : memref<128x128xbf16, #tpu.memory_space<vmem>>, vector<128x128xbf16>
    %cst = arith.constant dense<0.000000e+00> : vector<64x128xf32>
    %6 = tpu.matmul %4, %5, %cst {dimension_numbers = #tpu.dot_dimension_numbers<[1], [0], [0], [1], [0, 0, 1, 1], [], []>} : vector<64x128xbf16>, vector<128x128xbf16>, vector<64x128xf32> -> vector<64x128xf32>
    %7 = arith.addf %3, %6 : vector<64x128xf32>
    %c0_6 = arith.constant 0 : index
    %c0_7 = arith.constant 0 : index
    %8 = vector.load %arg7[%c0_6, %c0_7] : memref<64x128xf32, #tpu.memory_space<vmem>>, vector<64x128xf32>
    tpu.vector_store %arg7[%c0_6, %c0_7], %7 {strides = array<i32>} : memref<64x128xf32, #tpu.memory_space<vmem>>, vector<64x128xf32>,
    %c0_i32_8 = arith.constant 0 : i32
    %9 = arith.cmpi eq, %arg1, %c0_i32_8 : i32
    %10 = arith.extui %9 : i1 to i32
    %c0_i32_9 = arith.constant 0 : i32
    %11 = arith.cmpi ne, %10, %c0_i32_9 : i32
    scf.if %11 {
      %c0_10 = arith.constant 0 : index
      %c0_11 = arith.constant 0 : index
      %12 = vector.load %arg7[%c0_10, %c0_11] : memref<64x128xf32, #tpu.memory_space<vmem>>, vector<64x128xf32>
      %c0_12 = arith.constant 0 : index
      %c0_13 = arith.constant 0 : index
      %13 = vector.load %arg4[%c0_12, %c0_13] : memref<1x128xf32, #tpu.memory_space<vmem>>, vector<1x128xf32>
      %14 = vector.broadcast %13 : vector<1x128xf32> to vector<64x128xf32>
      %15 = arith.addf %12, %14 : vector<64x128xf32>
      %16 = arith.truncf %15 : vector<64x128xf32> to vector<64x128xbf16>
      %c0_14 = arith.constant 0 : index
      %c0_15 = arith.constant 0 : index
      %17 = vector.load %arg5[%c0_14, %c0_15] : memref<64x128xbf16, #tpu.memory_space<vmem>>, vector<64x128xbf16>
      tpu.vector_store %arg5[%c0_14, %c0_15], %16 {strides = array<i32>} : memref<64x128xbf16, #tpu.memory_space<vmem>>, vector<64x128xbf16>,
      %cst_16 = arith.constant dense<0.000000e+00> : vector<128xf32>
      %18 = vector.multi_reduction <add>, %12, %cst_16 [0] : vector<64x128xf32> to vector<128xf32>
      %19 = vector.shape_cast %18 : vector<128xf32> to vector<1x128xf32>
      %20 = arith.mulf %12, %12 : vector<64x128xf32>
      %cst_17 = arith.constant dense<0.000000e+00> : vector<128xf32>
      %21 = vector.multi_reduction <add>, %20, %cst_17 [0] : vector<64x128xf32> to vector<128xf32>
      %22 = vector.shape_cast %21 : vector<128xf32> to vector<1x128xf32>
      %23 = tpu.iota {dimensions = array<i32: 0>} : vector<8x128xi32>
      %c4_i32 = arith.constant 4 : i32
      %24 = vector.broadcast %c4_i32 : i32 to vector<8x128xi32>
      %25 = arith.cmpi slt, %23, %24 : vector<8x128xi32>
      %26 = vector.shape_cast %19 : vector<1x128xf32> to vector<1x128xf32>
      %27 = vector.broadcast %26 : vector<1x128xf32> to vector<8x128xf32>
      %28 = vector.shape_cast %22 : vector<1x128xf32> to vector<1x128xf32>
      %29 = vector.broadcast %28 : vector<1x128xf32> to vector<8x128xf32>
      %30 = arith.select %25, %27, %29 : vector<8x128xi1>, vector<8x128xf32>
      %31 = vector.shape_cast %30 : vector<8x128xf32> to vector<1x8x128xf32>
      %c0_18 = arith.constant 0 : index
      %c0_19 = arith.constant 0 : index
      %c0_20 = arith.constant 0 : index
      %32 = vector.load %arg6[%c0_18, %c0_19, %c0_20] : memref<1x8x128xf32, #tpu.memory_space<vmem>>, vector<1x8x128xf32>
      tpu.vector_store %arg6[%c0_18, %c0_19, %c0_20], %31 {strides = array<i32>} : memref<1x8x128xf32, #tpu.memory_space<vmem>>, vector<1x8x128xf32>,
    } else {
    }
    return
  }
  func.func @transform_0(%arg0: i32, %arg1: i32) -> (i32, i32) {
    %c0_i32 = arith.constant 0 : i32
    return %arg0, %arg1 : i32, i32
  }
  func.func @transform_1(%arg0: i32, %arg1: i32) -> (i32, i32) {
    %c0_i32 = arith.constant 0 : i32
    %c0_i32_0 = arith.constant 0 : i32
    return %arg1, %c0_i32 : i32, i32
  }
  func.func @transform_2(%arg0: i32, %arg1: i32) -> (i32, i32) {
    %c0_i32 = arith.constant 0 : i32
    %c0_i32_0 = arith.constant 0 : i32
    %c0_i32_1 = arith.constant 0 : i32
    return %c0_i32, %c0_i32_0 : i32, i32
  }
  func.func @transform_3(%arg0: i32, %arg1: i32) -> (i32, i32) {
    %c0_i32 = arith.constant 0 : i32
    %c0_i32_0 = arith.constant 0 : i32
    return %arg0, %c0_i32 : i32, i32
  }
  func.func @transform_4(%arg0: i32, %arg1: i32) -> (i32, i32, i32) {
    %c0_i32 = arith.constant 0 : i32
    %c0_i32_0 = arith.constant 0 : i32
    %c0_i32_1 = arith.constant 0 : i32
    return %arg0, %c0_i32, %c0_i32_0 : i32, i32, i32
  }
}

module attributes {stable_mosaic.version = 11 : i64} {
  func.func @_bn_act_kernel(%arg0: i32, %arg1: memref<64x128xbf16, #tpu.memory_space<vmem>>, %arg2: memref<1x128xf32, #tpu.memory_space<vmem>>, %arg3: memref<1x128xf32, #tpu.memory_space<vmem>>, %arg4: memref<64x128xbf16, #tpu.memory_space<vmem>>) attributes {dimension_semantics = [#tpu.dimension_semantics<parallel>], iteration_bounds = array<i64: 2>, scalar_prefetch = 0 : i64, scratch_operands = 0 : i64, tpu.core_type = #tpu.core_type<tc>, window_params = [{transform_indices = @transform_0, window_bounds = array<i64: 64, 128>}, {pipeline_mode = #tpu.pipeline_mode<synchronous>, transform_indices = @transform_1, window_bounds = array<i64: 1, 128>}, {pipeline_mode = #tpu.pipeline_mode<synchronous>, transform_indices = @transform_2, window_bounds = array<i64: 1, 128>}, {transform_indices = @transform_3, window_bounds = array<i64: 64, 128>}]} {
    %c0 = arith.constant 0 : index
    %c0_0 = arith.constant 0 : index
    %0 = vector.load %arg1[%c0, %c0_0] : memref<64x128xbf16, #tpu.memory_space<vmem>>, vector<64x128xbf16>
    %1 = arith.extf %0 : vector<64x128xbf16> to vector<64x128xf32>
    %c0_1 = arith.constant 0 : index
    %c0_2 = arith.constant 0 : index
    %2 = vector.load %arg2[%c0_1, %c0_2] : memref<1x128xf32, #tpu.memory_space<vmem>>, vector<1x128xf32>
    %3 = vector.broadcast %2 : vector<1x128xf32> to vector<64x128xf32>
    %4 = arith.mulf %1, %3 : vector<64x128xf32>
    %c0_3 = arith.constant 0 : index
    %c0_4 = arith.constant 0 : index
    %5 = vector.load %arg3[%c0_3, %c0_4] : memref<1x128xf32, #tpu.memory_space<vmem>>, vector<1x128xf32>
    %6 = vector.broadcast %5 : vector<1x128xf32> to vector<64x128xf32>
    %7 = arith.addf %4, %6 : vector<64x128xf32>
    %cst = arith.constant 0.000000e+00 : f32
    %8 = vector.broadcast %cst : f32 to vector<64x128xf32>
    %9 = arith.maximumf %7, %8 : vector<64x128xf32>
    %10 = arith.truncf %9 : vector<64x128xf32> to vector<64x128xbf16>
    %c0_5 = arith.constant 0 : index
    %c0_6 = arith.constant 0 : index
    %11 = vector.load %arg4[%c0_5, %c0_6] : memref<64x128xbf16, #tpu.memory_space<vmem>>, vector<64x128xbf16>
    tpu.vector_store %arg4[%c0_5, %c0_6], %10 {strides = array<i32>} : memref<64x128xbf16, #tpu.memory_space<vmem>>, vector<64x128xbf16>,
    return
  }
  func.func @transform_0(%arg0: i32) -> (i32, i32) {
    %c0_i32 = arith.constant 0 : i32
    %c0_i32_0 = arith.constant 0 : i32
    return %arg0, %c0_i32 : i32, i32
  }
  func.func @transform_1(%arg0: i32) -> (i32, i32) {
    %c0_i32 = arith.constant 0 : i32
    %c0_i32_0 = arith.constant 0 : i32
    %c0_i32_1 = arith.constant 0 : i32
    return %c0_i32, %c0_i32_0 : i32, i32
  }
  func.func @transform_2(%arg0: i32) -> (i32, i32) {
    %c0_i32 = arith.constant 0 : i32
    %c0_i32_0 = arith.constant 0 : i32
    %c0_i32_1 = arith.constant 0 : i32
    return %c0_i32, %c0_i32_0 : i32, i32
  }
  func.func @transform_3(%arg0: i32) -> (i32, i32) {
    %c0_i32 = arith.constant 0 : i32
    %c0_i32_0 = arith.constant 0 : i32
    return %arg0, %c0_i32 : i32, i32
  }
}

module attributes {stable_mosaic.version = 11 : i64} {
  func.func @_bn_res_relu_kernel(%arg0: i32, %arg1: memref<64x128xbf16, #tpu.memory_space<vmem>>, %arg2: memref<1x128xf32, #tpu.memory_space<vmem>>, %arg3: memref<1x128xf32, #tpu.memory_space<vmem>>, %arg4: memref<64x128xbf16, #tpu.memory_space<vmem>>, %arg5: memref<1x128xf32, #tpu.memory_space<vmem>>, %arg6: memref<1x128xf32, #tpu.memory_space<vmem>>, %arg7: memref<64x128xf32, #tpu.memory_space<vmem>>) attributes {dimension_semantics = [#tpu.dimension_semantics<parallel>], iteration_bounds = array<i64: 2>, scalar_prefetch = 0 : i64, scratch_operands = 0 : i64, tpu.core_type = #tpu.core_type<tc>, window_params = [{transform_indices = @transform_0, window_bounds = array<i64: 64, 128>}, {pipeline_mode = #tpu.pipeline_mode<synchronous>, transform_indices = @transform_1, window_bounds = array<i64: 1, 128>}, {pipeline_mode = #tpu.pipeline_mode<synchronous>, transform_indices = @transform_2, window_bounds = array<i64: 1, 128>}, {transform_indices = @transform_3, window_bounds = array<i64: 64, 128>}, {pipeline_mode = #tpu.pipeline_mode<synchronous>, transform_indices = @transform_4, window_bounds = array<i64: 1, 128>}, {pipeline_mode = #tpu.pipeline_mode<synchronous>, transform_indices = @transform_5, window_bounds = array<i64: 1, 128>}, {transform_indices = @transform_6, window_bounds = array<i64: 64, 128>}]} {
    %c0 = arith.constant 0 : index
    %c0_0 = arith.constant 0 : index
    %0 = vector.load %arg1[%c0, %c0_0] : memref<64x128xbf16, #tpu.memory_space<vmem>>, vector<64x128xbf16>
    %1 = arith.extf %0 : vector<64x128xbf16> to vector<64x128xf32>
    %c0_1 = arith.constant 0 : index
    %c0_2 = arith.constant 0 : index
    %2 = vector.load %arg2[%c0_1, %c0_2] : memref<1x128xf32, #tpu.memory_space<vmem>>, vector<1x128xf32>
    %3 = vector.broadcast %2 : vector<1x128xf32> to vector<64x128xf32>
    %4 = arith.mulf %1, %3 : vector<64x128xf32>
    %c0_3 = arith.constant 0 : index
    %c0_4 = arith.constant 0 : index
    %5 = vector.load %arg3[%c0_3, %c0_4] : memref<1x128xf32, #tpu.memory_space<vmem>>, vector<1x128xf32>
    %6 = vector.broadcast %5 : vector<1x128xf32> to vector<64x128xf32>
    %7 = arith.addf %4, %6 : vector<64x128xf32>
    %c0_5 = arith.constant 0 : index
    %c0_6 = arith.constant 0 : index
    %8 = vector.load %arg4[%c0_5, %c0_6] : memref<64x128xbf16, #tpu.memory_space<vmem>>, vector<64x128xbf16>
    %9 = arith.extf %8 : vector<64x128xbf16> to vector<64x128xf32>
    %c0_7 = arith.constant 0 : index
    %c0_8 = arith.constant 0 : index
    %10 = vector.load %arg5[%c0_7, %c0_8] : memref<1x128xf32, #tpu.memory_space<vmem>>, vector<1x128xf32>
    %11 = vector.broadcast %10 : vector<1x128xf32> to vector<64x128xf32>
    %12 = arith.mulf %9, %11 : vector<64x128xf32>
    %13 = arith.addf %7, %12 : vector<64x128xf32>
    %c0_9 = arith.constant 0 : index
    %c0_10 = arith.constant 0 : index
    %14 = vector.load %arg6[%c0_9, %c0_10] : memref<1x128xf32, #tpu.memory_space<vmem>>, vector<1x128xf32>
    %15 = vector.broadcast %14 : vector<1x128xf32> to vector<64x128xf32>
    %16 = arith.addf %13, %15 : vector<64x128xf32>
    %cst = arith.constant 0.000000e+00 : f32
    %17 = vector.broadcast %cst : f32 to vector<64x128xf32>
    %18 = arith.maximumf %16, %17 : vector<64x128xf32>
    %c0_11 = arith.constant 0 : index
    %c0_12 = arith.constant 0 : index
    %19 = vector.load %arg7[%c0_11, %c0_12] : memref<64x128xf32, #tpu.memory_space<vmem>>, vector<64x128xf32>
    tpu.vector_store %arg7[%c0_11, %c0_12], %18 {strides = array<i32>} : memref<64x128xf32, #tpu.memory_space<vmem>>, vector<64x128xf32>,
    return
  }
  func.func @transform_0(%arg0: i32) -> (i32, i32) {
    %c0_i32 = arith.constant 0 : i32
    %c0_i32_0 = arith.constant 0 : i32
    return %arg0, %c0_i32 : i32, i32
  }
  func.func @transform_1(%arg0: i32) -> (i32, i32) {
    %c0_i32 = arith.constant 0 : i32
    %c0_i32_0 = arith.constant 0 : i32
    %c0_i32_1 = arith.constant 0 : i32
    return %c0_i32, %c0_i32_0 : i32, i32
  }
  func.func @transform_2(%arg0: i32) -> (i32, i32) {
    %c0_i32 = arith.constant 0 : i32
    %c0_i32_0 = arith.constant 0 : i32
    %c0_i32_1 = arith.constant 0 : i32
    return %c0_i32, %c0_i32_0 : i32, i32
  }
  func.func @transform_3(%arg0: i32) -> (i32, i32) {
    %c0_i32 = arith.constant 0 : i32
    %c0_i32_0 = arith.constant 0 : i32
    return %arg0, %c0_i32 : i32, i32
  }
  func.func @transform_4(%arg0: i32) -> (i32, i32) {
    %c0_i32 = arith.constant 0 : i32
    %c0_i32_0 = arith.constant 0 : i32
    %c0_i32_1 = arith.constant 0 : i32
    return %c0_i32, %c0_i32_0 : i32, i32
  }
  func.func @transform_5(%arg0: i32) -> (i32, i32) {
    %c0_i32 = arith.constant 0 : i32
    %c0_i32_0 = arith.constant 0 : i32
    %c0_i32_1 = arith.constant 0 : i32
    return %c0_i32, %c0_i32_0 : i32, i32
  }
  func.func @transform_6(%arg0: i32) -> (i32, i32) {
    %c0_i32 = arith.constant 0 : i32
    %c0_i32_0 = arith.constant 0 : i32
    return %arg0, %c0_i32 : i32, i32
  }
}

</mosaic_0001>

<bundles_post_ra>
// kernel: basic_block_forward.6
= control target key start
LH: loop header
LB: loop body
LE: loop exit
PB: predicated region body
PF: predicated region fallthrough
CT: control target
= control target key end

     0   :  { %s385_s12 = smov 0   ;;  %s415_s0 = inlined_call_operand.vmem [shape: bf16[128,128], index: 0, kind: input, shape index: {}]   ;;  %s416_s1 = inlined_call_operand.vmem [shape: f32[1,128], index: 1, kind: input, shape index: {}]   ;;  %s417_s2 = inlined_call_operand.vmem [shape: f32[1,128], index: 2, kind: input, shape index: {}]   ;;  %s418_s3 = inlined_call_operand.vmem [shape: bf16[128,128], index: 3, kind: output, shape index: {}]  }
   0x1 LB: > { %s294_s13 = sadd.s32 4294967295, %s363_s12   ;;  %p298_p0 = scmp.ge.s32.totalorder %s363_s12, 1  ;;  %s363_s12 = sphi %s385_s12, %s13_s12  }
   0x2   : > { %p138_p1 = scmp.lt.s32.totalorder %s363_s12, 3 }
   0x4   : > { %p139_p2 = pnand %p298_p0, %p138_p1 }
   0x5   : > { %s299_s14 = sshll.u32 (!%p139_p2), %s294_s13, 3 }
   0x6   : > { %142 = sbr.rel (%p139_p2) target bundleno = 29 (0x1d), region = 32  ;;  %p163_p3 = scmp.lt.s32.totalorder (!%p139_p2), %s299_s14, 15 }
   0xb   : > { %s420_s14 = smov (!%p163_p3, %s299_s14), 15  ;;  %v355_v0 = vld [vmem:[%s416_s1] ss:$0 sm:$0xff] }
   0xc   : > { %s300_s15 = sshll.u32 %s420_s14, 2  ;;  %v356_v6 = vld [vmem:[%s417_s2] ss:$0 sm:$0xff] }
   0xd   : > { %s166_s18 = scalar_lea.vmem %s415_s0, %s300_s15  ;;  %s172_s25 = scalar_lea.vmem %s418_s3, %s300_s15 }
   0xe   : > { %v306_v1 = vld [vmem:[%s166_s18] sm:$0xff]   ;;  %v341_v2 = vld [vmem:[%s166_s18 + $0x8] sm:$0xff]   ;;  %v342_v3 = vld [vmem:[%s166_s18 + $0x10] sm:$0xff]  }
   0xf   : > { %v307_v4 = vunpack.c.l.bf16 %v306_v1  ;;  %v308_v5 = vunpack.c.h.bf16 %v306_v1  ;;  %v311_v7 = vunpack.c.l.bf16 %v341_v2  ;;  %v312_v8 = vunpack.c.h.bf16 %v341_v2  ;;  %v343_v9 = vld [vmem:[%s166_s18 + $0x18] sm:$0xff]  }
  0x10   : > { %v315_v10 = vunpack.c.l.bf16 %v342_v3  ;;  %v316_v11 = vunpack.c.h.bf16 %v342_v3  ;;  %v319_v12 = vunpack.c.l.bf16 %v343_v9  ;;  %v320_v13 = vunpack.c.h.bf16 %v343_v9 }
  0x11   : > { %v194_v14 = vmul.f32 %v355_v0, %v307_v4  ;;  %v195_v15 = vmul.f32 %v355_v0, %v308_v5  ;;  %v196_v16 = vmul.f32 %v355_v0, %v311_v7  ;;  %v197_v17 = vmul.f32 %v355_v0, %v312_v8 }
  0x12   : > { %v198_v18 = vmul.f32 %v355_v0, %v315_v10  ;;  %v199_v19 = vmul.f32 %v355_v0, %v316_v11  ;;  %v200_v20 = vmul.f32 %v355_v0, %v319_v12  ;;  %v201_v21 = vmul.f32 %v355_v0, %v320_v13 }
  0x13   : > { %v206_v22 = vadd.f32 %v356_v6, %v194_v14  ;;  %v207_v23 = vadd.f32 %v356_v6, %v195_v15  ;;  %v208_v24 = vadd.f32 %v356_v6, %v196_v16  ;;  %v209_v25 = vadd.f32 %v356_v6, %v197_v17 }
  0x14   : > { %v210_v26 = vadd.f32 %v356_v6, %v198_v18  ;;  %v211_v27 = vadd.f32 %v356_v6, %v199_v19  ;;  %v212_v28 = vadd.f32 %v356_v6, %v200_v20  ;;  %v213_v29 = vadd.f32 %v356_v6, %v201_v21 }
  0x15   : > { %v214_v30 = vmax.f32 %v206_v22, 0.0  ;;  %v215_v31 = vmax.f32 %v207_v23, 0.0  ;;  %v216_v32 = vmax.f32 %v208_v24, 0.0  ;;  %v217_v33 = vmax.f32 %v209_v25, 0.0 }
  0x16   : > { %v218_v34 = vmax.f32 %v210_v26, 0.0  ;;  %v219_v35 = vmax.f32 %v211_v27, 0.0  ;;  %v220_v36 = vmax.f32 %v212_v28, 0.0  ;;  %v221_v37 = vmax.f32 %v213_v29, 0.0 }
  0x17   : > { %v324_v38 = vpack.c.bf16 %v215_v31, %v214_v30  ;;  %v329_v39 = vpack.c.bf16 %v217_v33, %v216_v32 }
  0x18   : > { %v334_v40 = vpack.c.bf16 %v219_v35, %v218_v34  ;;  %v339_v41 = vpack.c.bf16 %v221_v37, %v220_v36 }
  0x19   : > { %325 = vst [vmem:[%s172_s25] sm:$0xff] %v324_v38  }
  0x1a   : > { %344 = vst [vmem:[%s172_s25 + $0x8] sm:$0xff] %v329_v39  }
  0x1b   : > { %345 = vst [vmem:[%s172_s25 + $0x10] sm:$0xff] %v334_v40  }
  0x1c   : > { %346 = vst [vmem:[%s172_s25 + $0x18] sm:$0xff] %v339_v41  }
  0x1d PF: > { %s13_s12 = sadd.s32 1, %s363_s12  }
  0x1e   : > { %p10_p4 = scmp.ge.s32.totalorder %s13_s12, 4  }
  0x20   :  { %12 = sbr.rel (!%p10_p4) target bundleno = 1 (0x1), region = 62 }

// kernel: basic_block_forward.5
= control target key start
LH: loop header
LB: loop body
LE: loop exit
PB: predicated region body
PF: predicated region fallthrough
CT: control target
= control target key end

     0   :  { %s804_s15 = smov 0   ;;  %s806_s16 = smov 0   ;;  %s879_s0 = inlined_call_operand.vmem [shape: bf16[128,128], index: 0, kind: input, shape index: {}]   ;;  %s880_s1 = inlined_call_operand.vmem [shape: bf16[128,128], index: 1, kind: input, shape index: {}]   ;;  %s881_s2 = inlined_call_operand.vmem [shape: f32[1,128], index: 2, kind: input, shape index: {}]   ;;  %s882_s3 = inlined_call_operand.vmem [shape: bf16[128,128], index: 3, kind: output, shape index: {0}]   ;;  %s883_s4 = inlined_call_operand.vmem [shape: f32[2,8,128], index: 4, kind: output, shape index: {1}]  }
   0x1   :  { %s808_s17 = smov 0  }
   0x2 LB: > { %s27_s18 = sadd.s32 1, %s773_s16  ;;  %p615_p0 = scmp.ge.s32.totalorder %s777_s17, 1  ;;  %s777_s17 = sphi %s808_s17, %s15_s17   ;;  %s773_s16 = sphi %s806_s16, %s885_s16   ;;  %s769_s15 = sphi %s804_s15, %s884_s15  }
   0x3   : > { %p29_p1 = scmp.ge.s32.totalorder %s27_s18, 2  ;;  %p194_p2 = scmp.lt.s32.totalorder %s777_s17, 3 }
   0x5   : > { %s887_s18 = smov (%p29_p1, %s27_s18), 0  ;;  %p195_p3 = pnand %p615_p0, %p194_p2 }
   0x6   : > { %s616_s27 = sshll.u32 (!%p195_p3), %s769_s15, 3  ;;  %p253_p5 = scmp.lt.s32.totalorder (!%p195_p3), %s769_s15, 1 }
   0x7   : > { %198 = sbr.rel (%p195_p3) target bundleno = 208 (0xd0), region = 32  ;;  %p233_p4 = scmp.lt.s32.totalorder (!%p195_p3), %s616_s27, 15 }
   0xc   : > { %v682_v0 = vld [vmem:[%s880_s1 + $0x38] sm:$0xff]  ;;  %v681_v1 = vld [vmem:[%s880_s1 + $0x30] sm:$0xff]  ;;  %v680_v2 = vld [vmem:[%s880_s1 + $0x28] sm:$0xff]  ;;  %s889_s27 = smov (!%p233_p4, %s616_s27), 15  ;;  %v491_v58 = vlaneseq  ;;  %s891_s15 = smov (!%p253_p5, %s769_s15), 1 }
   0xd   : > { %373 = vmatpush.bf16.msra.mxu0 %v682_v0  ;;  %706 = vmatpush.bf16.msra.mxu1 %v682_v0  ;;  %v679_v3 = vld [vmem:[%s880_s1 + $0x20] sm:$0xff]  ;;  %v678_v4 = vld [vmem:[%s880_s1 + $0x18] sm:$0xff]  ;;  %v677_v5 = vld [vmem:[%s880_s1 + $0x10] sm:$0xff]  ;;  %s617_s8 = sshll.u32 %s889_s27, 2  ;;  %s620_s23 = sshll.u32 %s891_s15, 3 }
   0xe   : > { %707 = vmatpush.bf16.msra.mxu2 %v682_v0  ;;  %708 = vmatpush.bf16.msra.mxu3 %v682_v0  ;;  %v676_v6 = vld [vmem:[%s880_s1 + $0x8] sm:$0xff]  ;;  %v675_v7 = vld [vmem:[%s880_s1] sm:$0xff]  ;;  %s239_s13 = scalar_lea.vmem %s879_s0, %s617_s8  ;;  %s251_s22 = scalar_lea.vmem %s882_s3, %s617_s8  ;;  %v492_v63 = vshrl.u32 %v491_v58, 7 }
   0xf   : > { %v671_v8 = vld [vmem:[%s239_s13] sm:$0xff]  ;;  %v672_v9 = vld [vmem:[%s239_s13 + $0x8] sm:$0xff]  ;;  %v673_v10 = vld [vmem:[%s239_s13 + $0x10] sm:$0xff]  ;;  %s256_s26 = scalar_lea.vmem %s883_s4, %s620_s23 }
  0x10   : > { %v674_v11 = vld [vmem:[%s239_s13 + $0x18] sm:$0xff]  ;;  %v754_v14 = vld [vmem:[%s881_s2] ss:$0 sm:$0xff]  ;;  %vm493_vm0 = vcmp.lt.s32.totalorder %v492_v63, 4 }
  0x11   : > { %374 = vmatpush.bf16.msra.mxu0 %v681_v1  ;;  %709 = vmatpush.bf16.msra.mxu1 %v681_v1 }
  0x12   : > { %710 = vmatpush.bf16.msra.mxu2 %v681_v1  ;;  %711 = vmatpush.bf16.msra.mxu3 %v681_v1 }
  0x15   : > { %375 = vmatpush.bf16.msra.mxu0 %v680_v2  ;;  %712 = vmatpush.bf16.msra.mxu1 %v680_v2 }
  0x16   : > { %713 = vmatpush.bf16.msra.mxu2 %v680_v2  ;;  %714 = vmatpush.bf16.msra.mxu3 %v680_v2 }
  0x19   : > { %376 = vmatpush.bf16.msra.mxu0 %v679_v3  ;;  %715 = vmatpush.bf16.msra.mxu1 %v679_v3 }
  0x1a   : > { %716 = vmatpush.bf16.msra.mxu2 %v679_v3  ;;  %717 = vmatpush.bf16.msra.mxu3 %v679_v3 }
  0x1d   : > { %377 = vmatpush.bf16.msra.mxu0 %v678_v4  ;;  %718 = vmatpush.bf16.msra.mxu1 %v678_v4 }
  0x1e   : > { %719 = vmatpush.bf16.msra.mxu2 %v678_v4  ;;  %720 = vmatpush.bf16.msra.mxu3 %v678_v4 }
  0x21   : > { %378 = vmatpush.bf16.msra.mxu0 %v677_v5  ;;  %721 = vmatpush.bf16.msra.mxu1 %v677_v5 }
  0x22   : > { %722 = vmatpush.bf16.msra.mxu2 %v677_v5  ;;  %723 = vmatpush.bf16.msra.mxu3 %v677_v5 }
  0x25   : > { %379 = vmatpush.bf16.msra.mxu0 %v676_v6  ;;  %724 = vmatpush.bf16.msra.mxu1 %v676_v6 }
  0x26   : > { %725 = vmatpush.bf16.msra.mxu2 %v676_v6  ;;  %726 = vmatpush.bf16.msra.mxu3 %v676_v6 }
  0x29   : > { %380 = vmatpush.bf16.msra.mxu0 %v675_v7  ;;  %727 = vmatpush.bf16.msra.mxu1 %v675_v7 }
  0x2a   : > { %728 = vmatpush.bf16.msra.mxu2 %v675_v7  ;;  %729 = vmatpush.bf16.msra.mxu3 %v675_v7 }
  0x2c   : > { %381 = vmatmul.bf16.vlgmr.msra.gmra.mxu0 %v671_v8  ;;  %386 = vmatmul.bf16.vlgmr.msra.gmra.mxu1 %v672_v9 }
  0x2d   : > { %391 = vmatmul.bf16.vlgmr.msra.gmra.mxu2 %v673_v10  ;;  %396 = vmatmul.bf16.vlgmr.msra.gmra.mxu3 %v674_v11 }
  0xa9   : > { %v382_v12 = vpop.f32.mrf.mxu0  ;;  %v387_v13 = vpop.f32.mrf.mxu1 }
  0xaa   : > { %v433_v17 = vadd.f32 %v754_v14, %v382_v12  ;;  %v470_v18 = vmul.f32 %v382_v12, %v382_v12  ;;  %v435_v19 = vadd.f32 %v754_v14, %v387_v13  ;;  %v472_v26 = vmul.f32 %v387_v13, %v387_v13 }
  0xb0   : > { %v392_v15 = vpop.f32.mrf.mxu2  ;;  %v397_v16 = vpop.f32.mrf.mxu3 }
  0xb1   : > { %v384_v20 = vpop.f32.mrf.mxu0  ;;  %v389_v21 = vpop.f32.mrf.mxu1  ;;  %v474_v34 = vmul.f32 %v392_v15, %v392_v15  ;;  %v437_v39 = vadd.f32 %v754_v14, %v392_v15  ;;  %v439_v40 = vadd.f32 %v754_v14, %v397_v16  ;;  %v476_v48 = vmul.f32 %v397_v16, %v397_v16 }
  0xb2   : > { %v434_v22 = vadd.f32 %v754_v14, %v384_v20  ;;  %v457_v23 = vadd.f32 %v384_v20, %v382_v12  ;;  %v471_v24 = vmul.f32 %v384_v20, %v384_v20  ;;  %v436_v25 = vadd.f32 %v754_v14, %v389_v21 }
  0xb3   : > { %v473_v32 = vmul.f32 %v389_v21, %v389_v21 }
  0xb4   : > { %v686_v27 = vpack.c.bf16 %v434_v22, %v433_v17  ;;  %v478_v28 = vadd.f32 %v471_v24, %v470_v18  ;;  %v691_v29 = vpack.c.bf16 %v436_v25, %v435_v19  ;;  %v458_v30 = vadd.f32 %v457_v23, %v387_v13 }
  0xb6   : > { %687 = vst [vmem:[%s251_s22] sm:$0xff] %v686_v27   ;;  %v459_v31 = vadd.f32 %v458_v30, %v389_v21  ;;  %v479_v33 = vadd.f32 %v478_v28, %v472_v26 }
  0xb7   : > { %703 = vst [vmem:[%s251_s22 + $0x8] sm:$0xff] %v691_v29  }
  0xb8   : > { %v480_v35 = vadd.f32 %v479_v33, %v473_v32  ;;  %v394_v36 = vpop.f32.mrf.mxu2  ;;  %v460_v37 = vadd.f32 %v459_v31, %v392_v15  ;;  %v399_v38 = vpop.f32.mrf.mxu3 }
  0xb9   : > { %v438_v41 = vadd.f32 %v754_v14, %v394_v36  ;;  %v440_v42 = vadd.f32 %v754_v14, %v399_v38  ;;  %v475_v44 = vmul.f32 %v394_v36, %v394_v36  ;;  %v477_v52 = vmul.f32 %v399_v38, %v399_v38 }
  0xba   : > { %v461_v43 = vadd.f32 %v460_v37, %v394_v36  ;;  %v481_v45 = vadd.f32 %v480_v35, %v474_v34 }
  0xbb   : > { %v696_v46 = vpack.c.bf16 %v438_v41, %v437_v39  ;;  %v701_v47 = vpack.c.bf16 %v440_v42, %v439_v40 }
  0xbc   : > { %v482_v49 = vadd.f32 %v481_v45, %v475_v44  ;;  %v462_v50 = vadd.f32 %v461_v43, %v397_v16 }
  0xbd   : > { %704 = vst [vmem:[%s251_s22 + $0x10] sm:$0xff] %v696_v46  }
  0xbe   : > { %705 = vst [vmem:[%s251_s22 + $0x18] sm:$0xff] %v701_v47   ;;  %v463_v51 = vadd.f32 %v462_v50, %v399_v38  ;;  %v483_v53 = vadd.f32 %v482_v49, %v476_v48 }
  0xc0   : > { %v464_v54 = vrot.slane %v463_v51, 4  ;;  %v484_v55 = vadd.f32 %v483_v53, %v477_v52 }
  0xc2   : > { %v465_v56 = vadd.f32 %v464_v54, %v463_v51  ;;  %v485_v57 = vrot.slane %v484_v55, 4 }
  0xc4   : > { %v466_v59 = vrot.slane %v465_v56, 2  ;;  %v486_v60 = vadd.f32 %v485_v57, %v484_v55 }
  0xc6   : > { %v467_v61 = vadd.f32 %v466_v59, %v465_v56  ;;  %v487_v62 = vrot.slane %v486_v60, 2 }
  0xc8   : > { %v468_v0 = vrot.slane %v467_v61, 1  ;;  %v488_v1 = vadd.f32 %v487_v62, %v486_v60 }
  0xca   : > { %v489_v2 = vrot.slane %v488_v1, 1  ;;  %v469_v3 = vadd.f32 %v468_v0, %v467_v61 }
  0xcc   : > { %v490_v4 = vadd.f32 %v489_v2, %v488_v1 }
  0xce   : > { %v494_v5 = vsel %vm493_vm0, %v469_v3, %v490_v4 }
  0xcf   : > { %495 = vst [vmem:[%s256_s26] sm:$0xff] %v494_v5 }
  0xd0 PF: > { %s15_s17 = sadd.s32 1, %s777_s17   ;;  %s884_s15 = smov %s773_s16 }
  0xd1   : > { %p12_p6 = scmp.ge.s32.totalorder %s15_s17, 4   ;;  %s885_s16 = smov %s887_s18 }
  0xd3   :  { %14 = sbr.rel (!%p12_p6) target bundleno = 2 (0x2), region = 85 }

// kernel: basic_block_forward.9
= control target key start
LH: loop header
LB: loop body
LE: loop exit
PB: predicated region body
PF: predicated region fallthrough
CT: control target
= control target key end

     0   :  { %s555_s21 = smov 0   ;;  %s643_s0 = inlined_call_operand.vmem [shape: bf16[128,128], index: 0, kind: input, shape index: {}]   ;;  %s644_s1 = inlined_call_operand.vmem [shape: f32[1,128], index: 1, kind: input, shape index: {}]   ;;  %s645_s2 = inlined_call_operand.vmem [shape: f32[1,128], index: 2, kind: input, shape index: {}]   ;;  %s646_s3 = inlined_call_operand.vmem [shape: bf16[128,128], index: 3, kind: input, shape index: {}]   ;;  %s647_s4 = inlined_call_operand.vmem [shape: f32[1,128], index: 4, kind: input, shape index: {}]   ;;  %s648_s5 = inlined_call_operand.vmem [shape: f32[1,128], index: 5, kind: input, shape index: {}]   ;;  %s649_s6 = inlined_call_operand.vmem [shape: f32[128,128], index: 6, kind: output, shape index: {}]  }
   0x1 LB: > { %s449_s22 = sadd.s32 4294967295, %s518_s21   ;;  %p453_p0 = scmp.ge.s32.totalorder %s518_s21, 1  ;;  %s518_s21 = sphi %s555_s21, %s16_s21  }
   0x2   : > { %p224_p1 = scmp.lt.s32.totalorder %s518_s21, 3 }
   0x4   : > { %p225_p2 = pnand %p453_p0, %p224_p1 }
   0x5   : > { %s454_s23 = sshll.u32 (!%p225_p2), %s449_s22, 3 }
   0x6   : > { %228 = sbr.rel (%p225_p2) target bundleno = 40 (0x28), region = 44  ;;  %p260_p3 = scmp.lt.s32.totalorder (!%p225_p2), %s454_s23, 15 }
   0xb   : > { %s651_s23 = smov (!%p260_p3, %s454_s23), 15  ;;  %v579_v0 = vld [vmem:[%s644_s1] ss:$0 sm:$0xff] }
   0xc   : > { %s455_s24 = sshll.u32 %s651_s23, 2  ;;  %v584_v1 = vld [vmem:[%s647_s4] ss:$0 sm:$0xff]  ;;  %s459_s15 = sshll.u32 %s651_s23, 3 }
   0xd   : > { %s569_s27 = scalar_lea.vmem %s643_s0, %s455_s24  ;;  %s574_s30 = scalar_lea.vmem %s646_s3, %s455_s24  ;;  %v592_v6 = vld [vmem:[%s645_s2] ss:$0 sm:$0xff] }
   0xe   : > { %v463_v2 = vld [vmem:[%s569_s27] sm:$0xff]   ;;  %v494_v4 = vld [vmem:[%s569_s27 + $0x8] sm:$0xff]   ;;  %v495_v15 = vld [vmem:[%s569_s27 + $0x10] sm:$0xff]   ;;  %s623_s18 = scalar_lea.vmem %s649_s6, %s459_s15 }
   0xf   : > { %v479_v3 = vld [vmem:[%s574_s30] sm:$0xff]   ;;  %v464_v5 = vunpack.c.l.bf16 %v463_v2  ;;  %v465_v8 = vunpack.c.h.bf16 %v463_v2  ;;  %v497_v10 = vld [vmem:[%s574_s30 + $0x8] sm:$0xff]   ;;  %v468_v11 = vunpack.c.l.bf16 %v494_v4  ;;  %v469_v13 = vunpack.c.h.bf16 %v494_v4  ;;  %v498_v16 = vld [vmem:[%s574_s30 + $0x10] sm:$0xff]  }
  0x10   : > { %v480_v7 = vunpack.c.l.bf16 %v479_v3  ;;  %v481_v9 = vunpack.c.h.bf16 %v479_v3  ;;  %v484_v12 = vunpack.c.l.bf16 %v497_v10  ;;  %v485_v14 = vunpack.c.h.bf16 %v497_v10  ;;  %v511_v26 = vld [vmem:[%s648_s5] ss:$0 sm:$0xff]  ;;  %v496_v34 = vld [vmem:[%s569_s27 + $0x18] sm:$0xff]  }
  0x11   : > { %v297_v17 = vmul.f32 %v579_v0, %v464_v5  ;;  %v298_v19 = vmul.f32 %v579_v0, %v465_v8  ;;  %v299_v21 = vmul.f32 %v579_v0, %v468_v11  ;;  %v300_v23 = vmul.f32 %v579_v0, %v469_v13  ;;  %v499_v39 = vld [vmem:[%s574_s30 + $0x18] sm:$0xff]  }
  0x12   : > { %v337_v18 = vmul.f32 %v584_v1, %v480_v7  ;;  %v338_v20 = vmul.f32 %v584_v1, %v481_v9  ;;  %v339_v22 = vmul.f32 %v584_v1, %v484_v12  ;;  %v340_v24 = vmul.f32 %v584_v1, %v485_v14 }
  0x13   : > { %v309_v25 = vadd.f32 %v592_v6, %v297_v17  ;;  %v310_v27 = vadd.f32 %v592_v6, %v298_v19  ;;  %v472_v28 = vunpack.c.l.bf16 %v495_v15  ;;  %v488_v29 = vunpack.c.l.bf16 %v498_v16 }
  0x14   : > { %v311_v30 = vadd.f32 %v592_v6, %v299_v21  ;;  %v312_v31 = vadd.f32 %v592_v6, %v300_v23  ;;  %v473_v32 = vunpack.c.h.bf16 %v495_v15  ;;  %v489_v33 = vunpack.c.h.bf16 %v498_v16 }
  0x15   : > { %v345_v35 = vadd.f32 %v337_v18, %v309_v25  ;;  %v346_v36 = vadd.f32 %v338_v20, %v310_v27  ;;  %v301_v37 = vmul.f32 %v579_v0, %v472_v28  ;;  %v341_v38 = vmul.f32 %v584_v1, %v488_v29 }
  0x16   : > { %v347_v40 = vadd.f32 %v339_v22, %v311_v30  ;;  %v348_v41 = vadd.f32 %v340_v24, %v312_v31  ;;  %v302_v42 = vmul.f32 %v579_v0, %v473_v32  ;;  %v342_v43 = vmul.f32 %v584_v1, %v489_v33 }
  0x17   : > { %v357_v44 = vadd.f32 %v511_v26, %v345_v35  ;;  %v358_v45 = vadd.f32 %v511_v26, %v346_v36  ;;  %v313_v46 = vadd.f32 %v592_v6, %v301_v37  ;;  %v476_v47 = vunpack.c.l.bf16 %v496_v34 }
  0x18   : > { %v359_v48 = vadd.f32 %v511_v26, %v347_v40  ;;  %v360_v49 = vadd.f32 %v511_v26, %v348_v41  ;;  %v314_v50 = vadd.f32 %v592_v6, %v302_v42  ;;  %v492_v51 = vunpack.c.l.bf16 %v499_v39 }
  0x19   : > { %v365_v52 = vmax.f32 %v357_v44, 0.0  ;;  %v366_v53 = vmax.f32 %v358_v45, 0.0  ;;  %v349_v54 = vadd.f32 %v341_v38, %v313_v46  ;;  %v303_v55 = vmul.f32 %v579_v0, %v476_v47 }
  0x1a   : > { %v367_v56 = vmax.f32 %v359_v48, 0.0  ;;  %v368_v57 = vmax.f32 %v360_v49, 0.0  ;;  %v350_v58 = vadd.f32 %v342_v43, %v314_v50  ;;  %v343_v59 = vmul.f32 %v584_v1, %v492_v51 }
  0x1b   : > { %373 = vst [vmem:[%s623_s18] sm:$0xff] %v365_v52  ;;  %v361_v60 = vadd.f32 %v511_v26, %v349_v54  ;;  %v315_v61 = vadd.f32 %v592_v6, %v303_v55  ;;  %v477_v62 = vunpack.c.h.bf16 %v496_v34  ;;  %v493_v63 = vunpack.c.h.bf16 %v499_v39 }
  0x1c   : > { %374 = vst [vmem:[%s623_s18 + $0x8] sm:$0xff] %v366_v53  ;;  %v362_v2 = vadd.f32 %v511_v26, %v350_v58 }
  0x1d   : > { %375 = vst [vmem:[%s623_s18 + $0x10] sm:$0xff] %v367_v56  ;;  %v369_v3 = vmax.f32 %v361_v60, 0.0  ;;  %v351_v4 = vadd.f32 %v343_v59, %v315_v61  ;;  %v304_v5 = vmul.f32 %v579_v0, %v477_v62  ;;  %v344_v7 = vmul.f32 %v584_v1, %v493_v63 }
  0x1e   : > { %376 = vst [vmem:[%s623_s18 + $0x18] sm:$0xff] %v368_v57  ;;  %v370_v8 = vmax.f32 %v362_v2, 0.0 }
  0x1f   : > { %377 = vst [vmem:[%s623_s18 + $0x20] sm:$0xff] %v369_v3  ;;  %v363_v9 = vadd.f32 %v511_v26, %v351_v4  ;;  %v316_v10 = vadd.f32 %v592_v6, %v304_v5 }
  0x20   : > { %378 = vst [vmem:[%s623_s18 + $0x28] sm:$0xff] %v370_v8 }
  0x21   : > { %v371_v11 = vmax.f32 %v363_v9, 0.0  ;;  %v352_v12 = vadd.f32 %v344_v7, %v316_v10 }
  0x23   : > { %379 = vst [vmem:[%s623_s18 + $0x30] sm:$0xff] %v371_v11  ;;  %v364_v13 = vadd.f32 %v511_v26, %v352_v12 }
  0x25   : > { %v372_v14 = vmax.f32 %v364_v13, 0.0 }
  0x27   : > { %380 = vst [vmem:[%s623_s18 + $0x38] sm:$0xff] %v372_v14 }
  0x28 PF: > { %s16_s21 = sadd.s32 1, %s518_s21  }
  0x29   : > { %p13_p4 = scmp.ge.s32.totalorder %s16_s21, 4  }
  0x2b   :  { %15 = sbr.rel (!%p13_p4) target bundleno = 1 (0x1), region = 77 }

</bundles_post_ra>
